<compile_context>
chip_gen: v7x
topology: tpu7x:2x2x1
jax: 0.10.0
libtpu: 0.0.40
codegen_flags: <defaults>
</compile_context>

<pallas_src>
import functools

import jax
import jax.numpy as jnp
import numpy as np
from jax.experimental import pallas as pl
from jax.experimental.pallas import tpu as pltpu


# ----------------------------- Pallas kernel --------------------------------
def _encoder_layer_kernel(
    x_ref, mask_ref,
    wqkv_ref, bqkv_ref, wo_ref, bo_ref,
    g1_ref, be1_ref, w1_ref, b1_ref, w2_ref, b2_ref, g2_ref, be2_ref,
    out_ref, *, num_heads, eps):
  x = x_ref[0]                       # (S, D) f32 — one batch element
  key_pad = mask_ref[0]              # (1, S) f32, 1.0 where key is padded
  S, D = x.shape
  dh = D // num_heads
  scale = jnp.float32(1.0 / np.sqrt(dh))

  x_bf = x.astype(jnp.bfloat16)

  # ---- fused QKV projection: one (S,D) x (D,3D) MXU pass, f32 accumulate ----
  qkv = jnp.dot(x_bf, wqkv_ref[...],
                preferred_element_type=jnp.float32) + bqkv_ref[...]
  q = qkv[:, :D] * scale
  k = qkv[:, D:2 * D]
  v = qkv[:, 2 * D:]

  qb = q.astype(jnp.bfloat16)
  kb = k.astype(jnp.bfloat16)
  vb = v.astype(jnp.bfloat16)

  # additive key-padding mask, broadcast hoisted out of the head loop
  neg = jnp.broadcast_to(key_pad * jnp.float32(-1e9), (S, S))

  # ---- per-head attention (small H -> static unroll), contexts concatenated
  #      so the output projection is a single full-width matmul ----
  ctx_parts = []
  for h in range(num_heads):
    sl = slice(h * dh, (h + 1) * dh)
    scores = jnp.einsum('qd,kd->qk', qb[:, sl], kb[:, sl],
                        preferred_element_type=jnp.float32) + neg   # (S, S)
    scores = scores - jnp.max(scores, axis=-1, keepdims=True)
    p = jnp.exp(scores)
    p = p * pl.reciprocal(jnp.sum(p, axis=-1, keepdims=True), approx=True)
    ctx_parts.append(jnp.dot(p.astype(jnp.bfloat16), vb[:, sl],
                             preferred_element_type=jnp.float32))   # (S, dh)
  ctx = jnp.concatenate(ctx_parts, axis=-1)                         # (S, D)

  # ---- single output projection (K = D, full MXU width) ----
  attn = jnp.dot(ctx.astype(jnp.bfloat16), wo_ref[...],
                 preferred_element_type=jnp.float32) + bo_ref[...]

  # ---- residual + LayerNorm 1 (f32) ----
  h1 = x + attn
  mu = jnp.mean(h1, axis=-1, keepdims=True)
  var = jnp.mean((h1 - mu) ** 2, axis=-1, keepdims=True)
  h1 = (h1 - mu) * jax.lax.rsqrt(var + eps) * g1_ref[...] + be1_ref[...]

  # ---- feed-forward: relu(fc1) -> fc2 (bf16 operands, f32 accumulate) ----
  f = jnp.dot(h1.astype(jnp.bfloat16), w1_ref[...],
              preferred_element_type=jnp.float32) + b1_ref[...]
  f = jnp.maximum(f, 0.0)
  f = jnp.dot(f.astype(jnp.bfloat16), w2_ref[...],
              preferred_element_type=jnp.float32) + b2_ref[...]

  # ---- residual + LayerNorm 2 (f32) ----
  h2 = h1 + f
  mu = jnp.mean(h2, axis=-1, keepdims=True)
  var = jnp.mean((h2 - mu) ** 2, axis=-1, keepdims=True)
  h2 = (h2 - mu) * jax.lax.rsqrt(var + eps) * g2_ref[...] + be2_ref[...]

  out_ref[0] = h2.astype(out_ref.dtype)


# ------------------------------- wrapper -------------------------------------
PARAM_ORDER = ('wqkv', 'bqkv', 'wo', 'bo',
               'g1', 'be1', 'w1', 'b1', 'w2', 'b2', 'g2', 'be2')


def transformer_encoder_layer(x_sbd, key_padding_mask, params, num_heads):
  S, B, D = x_sbd.shape
  x = jnp.transpose(x_sbd, (1, 0, 2)).astype(jnp.float32)       # (B, S, D)
  mask = key_padding_mask.astype(jnp.float32).reshape(B, 1, S)  # (B, 1, S)

  bf16 = jnp.bfloat16
  f32 = jnp.float32
  fused = {
      # fused QKV weight / bias
      'wqkv': jnp.concatenate(
          [params['wq'], params['wk'], params['wv']], axis=1).astype(bf16),
      'bqkv': jnp.concatenate(
          [params['bq'], params['bk'], params['bv']], axis=1).astype(f32),
      'wo': params['wo'].astype(bf16), 'bo': params['bo'].astype(f32),
      'g1': params['g1'].astype(f32), 'be1': params['be1'].astype(f32),
      'w1': params['w1'].astype(bf16), 'b1': params['b1'].astype(f32),
      'w2': params['w2'].astype(bf16), 'b2': params['b2'].astype(f32),
      'g2': params['g2'].astype(f32), 'be2': params['be2'].astype(f32),
  }
  plist = [fused[kname] for kname in PARAM_ORDER]

  def full_spec(shape):
    nd = len(shape)
    return pl.BlockSpec(shape, lambda b, _nd=nd: (0,) * _nd)

  in_specs = [
      pl.BlockSpec((1, S, D), lambda b: (b, 0, 0)),   # x (batch-major)
      pl.BlockSpec((1, 1, S), lambda b: (b, 0, 0)),   # key padding mask
  ] + [full_spec(p.shape) for p in plist]

  out = pl.pallas_call(
      functools.partial(_encoder_layer_kernel, num_heads=num_heads, eps=1e-5),
      grid=(B,),
      in_specs=in_specs,
      out_specs=pl.BlockSpec((1, S, D), lambda b: (b, 0, 0)),
      out_shape=jax.ShapeDtypeStruct((B, S, D), jnp.float32),
      compiler_params=pltpu.CompilerParams(
          dimension_semantics=("parallel",),        # megacore over batch
          vmem_limit_bytes=48 * 1024 * 1024),
  )(x, mask, *plist)
  return jnp.transpose(out, (1, 0, 2))              # back to (S, B, D)


# --------------------------- plain-JAX reference ------------------------------
def _layernorm(h, g, b, eps=1e-5):
  mu = jnp.mean(h, axis=-1, keepdims=True)
  var = jnp.mean((h - mu) ** 2, axis=-1, keepdims=True)
  return (h - mu) * jax.lax.rsqrt(var + eps) * g + b


def reference_forward(x_sbd, key_padding_mask, p, num_heads):
  S, B, D = x_sbd.shape
  dh = D // num_heads
  x = jnp.transpose(x_sbd, (1, 0, 2)).astype(jnp.float32)   # (B, S, D)
  q = x @ p['wq'] + p['bq']
  k = x @ p['wk'] + p['bk']
  v = x @ p['wv'] + p['bv']
  q = q * (1.0 / np.sqrt(dh))

  def split(t):
    return t.reshape(B, S, num_heads, dh).transpose(0, 2, 1, 3)

  qh, kh, vh = split(q), split(k), split(v)
  scores = jnp.einsum('bhqd,bhkd->bhqk', qh, kh)
  scores = scores + key_padding_mask.astype(jnp.float32)[:, None, None, :] * -1e9
  attn = jax.nn.softmax(scores, axis=-1)
  ctx = jnp.einsum('bhqk,bhkd->bhqd', attn, vh)
  ctx = ctx.transpose(0, 2, 1, 3).reshape(B, S, D)
  a = ctx @ p['wo'] + p['bo']
  h1 = _layernorm(x + a, p['g1'], p['be1'])
  f = jnp.maximum(h1 @ p['w1'] + p['b1'], 0.0) @ p['w2'] + p['b2']
  h2 = _layernorm(h1 + f, p['g2'], p['be2'])
  return jnp.transpose(h2, (1, 0, 2))


# --------------------------------- main ---------------------------------------
def init_params(key, d_model):
  d_ff = d_model << 1
  keys = jax.random.split(key, 8)
  s = 0.02

  def mat(k, shp):
    return jax.random.normal(k, shp, jnp.float32) * s

  return {
      'wq': mat(keys[0], (d_model, d_model)), 'bq': jnp.zeros((1, d_model), jnp.float32),
      'wk': mat(keys[1], (d_model, d_model)), 'bk': jnp.zeros((1, d_model), jnp.float32),
      'wv': mat(keys[2], (d_model, d_model)), 'bv': jnp.zeros((1, d_model), jnp.float32),
      'wo': mat(keys[3], (d_model, d_model)), 'bo': jnp.zeros((1, d_model), jnp.float32),
      'g1': jnp.ones((1, d_model), jnp.float32), 'be1': jnp.zeros((1, d_model), jnp.float32),
      'w1': mat(keys[4], (d_model, d_ff)),    'b1': jnp.full((1, d_ff), 0.01, jnp.float32),
      'w2': mat(keys[5], (d_ff, d_model)),    'b2': jnp.full((1, d_model), 0.01, jnp.float32),
      'g2': jnp.ones((1, d_model), jnp.float32), 'be2': jnp.zeros((1, d_model), jnp.float32),
  }


if __name__ == "__main__":
  S, B, D, H = 8, 2, 32, 4
  key = jax.random.PRNGKey(0)
  kx, kp = jax.random.split(key)
  x = jax.random.normal(kx, (S, B, D), jnp.float32)          # (seq, batch, d_model)
  # key padding mask: True == padded key position
  mask = jnp.zeros((B, S), dtype=bool).at[1, 6:].set(True)
  params = init_params(kp, D)

  out = transformer_encoder_layer(x, mask, params, H)
  out = jax.block_until_ready(out)

  ref = reference_forward(x, mask, params, H)         # f32 reference
  assert out.shape == (S, B, D)
  # bf16 MXU operands with f32 accumulation -> compare at bf16-level tolerance
  np.testing.assert_allclose(np.asarray(out), np.asarray(ref),
                             atol=2e-2, rtol=2e-2)
  print("KERNEL_OK")
</pallas_src>

<mosaic_0001>
module attributes {stable_mosaic.version = 11 : i64} {
  func.func @_encoder_layer_kernel(%arg0: i32, %arg1: memref<1x8x32xf32, #tpu.memory_space<vmem>>, %arg2: memref<1x1x8xf32, #tpu.memory_space<vmem>>, %arg3: memref<32x96xbf16, #tpu.memory_space<vmem>>, %arg4: memref<1x96xf32, #tpu.memory_space<vmem>>, %arg5: memref<32x32xbf16, #tpu.memory_space<vmem>>, %arg6: memref<1x32xf32, #tpu.memory_space<vmem>>, %arg7: memref<1x32xf32, #tpu.memory_space<vmem>>, %arg8: memref<1x32xf32, #tpu.memory_space<vmem>>, %arg9: memref<32x64xbf16, #tpu.memory_space<vmem>>, %arg10: memref<1x64xf32, #tpu.memory_space<vmem>>, %arg11: memref<64x32xbf16, #tpu.memory_space<vmem>>, %arg12: memref<1x32xf32, #tpu.memory_space<vmem>>, %arg13: memref<1x32xf32, #tpu.memory_space<vmem>>, %arg14: memref<1x32xf32, #tpu.memory_space<vmem>>, %arg15: memref<1x8x32xf32, #tpu.memory_space<vmem>>) attributes {dimension_semantics = [#tpu.dimension_semantics<parallel>], iteration_bounds = array<i64: 2>, scalar_prefetch = 0 : i64, scratch_operands = 0 : i64, tpu.core_type = #tpu.core_type<tc>, window_params = [{transform_indices = @transform_0, window_bounds = array<i64: 1, 8, 32>}, {transform_indices = @transform_1, window_bounds = array<i64: 1, 1, 8>}, {pipeline_mode = #tpu.pipeline_mode<synchronous>, transform_indices = @transform_2, window_bounds = array<i64: 32, 96>}, {pipeline_mode = #tpu.pipeline_mode<synchronous>, transform_indices = @transform_3, window_bounds = array<i64: 1, 96>}, {pipeline_mode = #tpu.pipeline_mode<synchronous>, transform_indices = @transform_4, window_bounds = array<i64: 32, 32>}, {pipeline_mode = #tpu.pipeline_mode<synchronous>, transform_indices = @transform_5, window_bounds = array<i64: 1, 32>}, {pipeline_mode = #tpu.pipeline_mode<synchronous>, transform_indices = @transform_6, window_bounds = array<i64: 1, 32>}, {pipeline_mode = #tpu.pipeline_mode<synchronous>, transform_indices = @transform_7, window_bounds = array<i64: 1, 32>}, {pipeline_mode = #tpu.pipeline_mode<synchronous>, transform_indices = @transform_8, window_bounds = array<i64: 32, 64>}, {pipeline_mode = #tpu.pipeline_mode<synchronous>, transform_indices = @transform_9, window_bounds = array<i64: 1, 64>}, {pipeline_mode = #tpu.pipeline_mode<synchronous>, transform_indices = @transform_10, window_bounds = array<i64: 64, 32>}, {pipeline_mode = #tpu.pipeline_mode<synchronous>, transform_indices = @transform_11, window_bounds = array<i64: 1, 32>}, {pipeline_mode = #tpu.pipeline_mode<synchronous>, transform_indices = @transform_12, window_bounds = array<i64: 1, 32>}, {pipeline_mode = #tpu.pipeline_mode<synchronous>, transform_indices = @transform_13, window_bounds = array<i64: 1, 32>}, {transform_indices = @transform_14, window_bounds = array<i64: 1, 8, 32>}]} {
    %c0 = arith.constant 0 : index
    %c0_0 = arith.constant 0 : index
    %c0_1 = arith.constant 0 : index
    %0 = vector.load %arg1[%c0, %c0_0, %c0_1] : memref<1x8x32xf32, #tpu.memory_space<vmem>>, vector<1x8x32xf32>
    %1 = vector.shape_cast %0 : vector<1x8x32xf32> to vector<8x32xf32>
    %c0_2 = arith.constant 0 : index
    %c0_3 = arith.constant 0 : index
    %c0_4 = arith.constant 0 : index
    %2 = vector.load %arg2[%c0_2, %c0_3, %c0_4] : memref<1x1x8xf32, #tpu.memory_space<vmem>>, vector<1x1x8xf32>
    %3 = vector.shape_cast %2 : vector<1x1x8xf32> to vector<1x8xf32>
    %4 = arith.truncf %1 : vector<8x32xf32> to vector<8x32xbf16>
    %c0_5 = arith.constant 0 : index
    %c0_6 = arith.constant 0 : index
    %5 = vector.load %arg3[%c0_5, %c0_6] : memref<32x96xbf16, #tpu.memory_space<vmem>>, vector<32x96xbf16>
    %cst = arith.constant dense<0.000000e+00> : vector<8x96xf32>
    %6 = tpu.matmul %4, %5, %cst {dimension_numbers = #tpu.dot_dimension_numbers<[1], [0], [0], [1], [0, 0, 1, 1], [], []>} : vector<8x32xbf16>, vector<32x96xbf16>, vector<8x96xf32> -> vector<8x96xf32>
    %c0_7 = arith.constant 0 : index
    %c0_8 = arith.constant 0 : index
    %7 = vector.load %arg4[%c0_7, %c0_8] : memref<1x96xf32, #tpu.memory_space<vmem>>, vector<1x96xf32>
    %8 = vector.broadcast %7 : vector<1x96xf32> to vector<8x96xf32>
    %9 = arith.addf %6, %8 : vector<8x96xf32>
    %10 = vector.extract_strided_slice %9 {offsets = [0, 0], sizes = [8, 32], strides = [1, 1]} : vector<8x96xf32> to vector<8x32xf32>
    %cst_9 = arith.constant 0.353553385 : f32
    %11 = vector.broadcast %cst_9 : f32 to vector<8x32xf32>
    %12 = arith.mulf %10, %11 : vector<8x32xf32>
    %13 = vector.extract_strided_slice %9 {offsets = [0, 32], sizes = [8, 32], strides = [1, 1]} : vector<8x96xf32> to vector<8x32xf32>
    %14 = vector.extract_strided_slice %9 {offsets = [0, 64], sizes = [8, 32], strides = [1, 1]} : vector<8x96xf32> to vector<8x32xf32>
    %15 = arith.truncf %12 : vector<8x32xf32> to vector<8x32xbf16>
    %16 = arith.truncf %13 : vector<8x32xf32> to vector<8x32xbf16>
    %17 = arith.truncf %14 : vector<8x32xf32> to vector<8x32xbf16>
    %cst_10 = arith.constant -1.000000e+09 : f32
    %18 = vector.broadcast %cst_10 : f32 to vector<1x8xf32>
    %19 = arith.mulf %3, %18 : vector<1x8xf32>
    %20 = vector.shape_cast %19 : vector<1x8xf32> to vector<1x8xf32>
    %21 = vector.broadcast %20 : vector<1x8xf32> to vector<8x8xf32>
    %22 = vector.extract_strided_slice %15 {offsets = [0, 0], sizes = [8, 8], strides = [1, 1]} : vector<8x32xbf16> to vector<8x8xbf16>
    %23 = vector.extract_strided_slice %16 {offsets = [0, 0], sizes = [8, 8], strides = [1, 1]} : vector<8x32xbf16> to vector<8x8xbf16>
    "tpu.trace_start"() <{level = 10 : i32, message = "qd,kd->qk"}> : () -> ()
    %cst_11 = arith.constant dense<0.000000e+00> : vector<8x8xf32>
    %24 = tpu.matmul %22, %23, %cst_11 {dimension_numbers = #tpu.dot_dimension_numbers<[1], [1], [0], [0], [0, 0, 1, 0], [], []>} : vector<8x8xbf16>, vector<8x8xbf16>, vector<8x8xf32> -> vector<8x8xf32>
    "tpu.trace_stop"() : () -> ()
    %25 = arith.addf %24, %21 : vector<8x8xf32>
    %cst_12 = arith.constant dense<0xFF800000> : vector<8xf32>
    %26 = vector.multi_reduction <maximumf>, %25, %cst_12 [1] : vector<8x8xf32> to vector<8xf32>
    %27 = vector.shape_cast %26 : vector<8xf32> to vector<8x1xf32>
    %28 = vector.broadcast %27 : vector<8x1xf32> to vector<8x8xf32>
    %29 = arith.subf %25, %28 : vector<8x8xf32>
    %30 = math.exp %29 : vector<8x8xf32>
    %cst_13 = arith.constant dense<0.000000e+00> : vector<8xf32>
    %31 = vector.multi_reduction <add>, %30, %cst_13 [1] : vector<8x8xf32> to vector<8xf32>
    %32 = vector.shape_cast %31 : vector<8xf32> to vector<8x1xf32>
    %33 = tpu.reciprocal %32 {approx = true} : vector<8x1xf32> -> vector<8x1xf32>
    %34 = vector.broadcast %33 : vector<8x1xf32> to vector<8x8xf32>
    %35 = arith.mulf %30, %34 : vector<8x8xf32>
    %36 = arith.truncf %35 : vector<8x8xf32> to vector<8x8xbf16>
    %37 = vector.extract_strided_slice %17 {offsets = [0, 0], sizes = [8, 8], strides = [1, 1]} : vector<8x32xbf16> to vector<8x8xbf16>
    %cst_14 = arith.constant dense<0.000000e+00> : vector<8x8xf32>
    %38 = tpu.matmul %36, %37, %cst_14 {dimension_numbers = #tpu.dot_dimension_numbers<[1], [0], [0], [1], [0, 0, 1, 1], [], []>} : vector<8x8xbf16>, vector<8x8xbf16>, vector<8x8xf32> -> vector<8x8xf32>
    %39 = vector.extract_strided_slice %15 {offsets = [0, 8], sizes = [8, 8], strides = [1, 1]} : vector<8x32xbf16> to vector<8x8xbf16>
    %40 = vector.extract_strided_slice %16 {offsets = [0, 8], sizes = [8, 8], strides = [1, 1]} : vector<8x32xbf16> to vector<8x8xbf16>
    "tpu.trace_start"() <{level = 10 : i32, message = "qd,kd->qk"}> : () -> ()
    %cst_15 = arith.constant dense<0.000000e+00> : vector<8x8xf32>
    %41 = tpu.matmul %39, %40, %cst_15 {dimension_numbers = #tpu.dot_dimension_numbers<[1], [1], [0], [0], [0, 0, 1, 0], [], []>} : vector<8x8xbf16>, vector<8x8xbf16>, vector<8x8xf32> -> vector<8x8xf32>
    "tpu.trace_stop"() : () -> ()
    %42 = arith.addf %41, %21 : vector<8x8xf32>
    %cst_16 = arith.constant dense<0xFF800000> : vector<8xf32>
    %43 = vector.multi_reduction <maximumf>, %42, %cst_16 [1] : vector<8x8xf32> to vector<8xf32>
    %44 = vector.shape_cast %43 : vector<8xf32> to vector<8x1xf32>
    %45 = vector.broadcast %44 : vector<8x1xf32> to vector<8x8xf32>
    %46 = arith.subf %42, %45 : vector<8x8xf32>
    %47 = math.exp %46 : vector<8x8xf32>
    %cst_17 = arith.constant dense<0.000000e+00> : vector<8xf32>
    %48 = vector.multi_reduction <add>, %47, %cst_17 [1] : vector<8x8xf32> to vector<8xf32>
    %49 = vector.shape_cast %48 : vector<8xf32> to vector<8x1xf32>
    %50 = tpu.reciprocal %49 {approx = true} : vector<8x1xf32> -> vector<8x1xf32>
    %51 = vector.broadcast %50 : vector<8x1xf32> to vector<8x8xf32>
    %52 = arith.mulf %47, %51 : vector<8x8xf32>
    %53 = arith.truncf %52 : vector<8x8xf32> to vector<8x8xbf16>
    %54 = vector.extract_strided_slice %17 {offsets = [0, 8], sizes = [8, 8], strides = [1, 1]} : vector<8x32xbf16> to vector<8x8xbf16>
    %cst_18 = arith.constant dense<0.000000e+00> : vector<8x8xf32>
    %55 = tpu.matmul %53, %54, %cst_18 {dimension_numbers = #tpu.dot_dimension_numbers<[1], [0], [0], [1], [0, 0, 1, 1], [], []>} : vector<8x8xbf16>, vector<8x8xbf16>, vector<8x8xf32> -> vector<8x8xf32>
    %56 = vector.extract_strided_slice %15 {offsets = [0, 16], sizes = [8, 8], strides = [1, 1]} : vector<8x32xbf16> to vector<8x8xbf16>
    %57 = vector.extract_strided_slice %16 {offsets = [0, 16], sizes = [8, 8], strides = [1, 1]} : vector<8x32xbf16> to vector<8x8xbf16>
    "tpu.trace_start"() <{level = 10 : i32, message = "qd,kd->qk"}> : () -> ()
    %cst_19 = arith.constant dense<0.000000e+00> : vector<8x8xf32>
    %58 = tpu.matmul %56, %57, %cst_19 {dimension_numbers = #tpu.dot_dimension_numbers<[1], [1], [0], [0], [0, 0, 1, 0], [], []>} : vector<8x8xbf16>, vector<8x8xbf16>, vector<8x8xf32> -> vector<8x8xf32>
    "tpu.trace_stop"() : () -> ()
    %59 = arith.addf %58, %21 : vector<8x8xf32>
    %cst_20 = arith.constant dense<0xFF800000> : vector<8xf32>
    %60 = vector.multi_reduction <maximumf>, %59, %cst_20 [1] : vector<8x8xf32> to vector<8xf32>
    %61 = vector.shape_cast %60 : vector<8xf32> to vector<8x1xf32>
    %62 = vector.broadcast %61 : vector<8x1xf32> to vector<8x8xf32>
    %63 = arith.subf %59, %62 : vector<8x8xf32>
    %64 = math.exp %63 : vector<8x8xf32>
    %cst_21 = arith.constant dense<0.000000e+00> : vector<8xf32>
    %65 = vector.multi_reduction <add>, %64, %cst_21 [1] : vector<8x8xf32> to vector<8xf32>
    %66 = vector.shape_cast %65 : vector<8xf32> to vector<8x1xf32>
    %67 = tpu.reciprocal %66 {approx = true} : vector<8x1xf32> -> vector<8x1xf32>
    %68 = vector.broadcast %67 : vector<8x1xf32> to vector<8x8xf32>
    %69 = arith.mulf %64, %68 : vector<8x8xf32>
    %70 = arith.truncf %69 : vector<8x8xf32> to vector<8x8xbf16>
    %71 = vector.extract_strided_slice %17 {offsets = [0, 16], sizes = [8, 8], strides = [1, 1]} : vector<8x32xbf16> to vector<8x8xbf16>
    %cst_22 = arith.constant dense<0.000000e+00> : vector<8x8xf32>
    %72 = tpu.matmul %70, %71, %cst_22 {dimension_numbers = #tpu.dot_dimension_numbers<[1], [0], [0], [1], [0, 0, 1, 1], [], []>} : vector<8x8xbf16>, vector<8x8xbf16>, vector<8x8xf32> -> vector<8x8xf32>
    %73 = vector.extract_strided_slice %15 {offsets = [0, 24], sizes = [8, 8], strides = [1, 1]} : vector<8x32xbf16> to vector<8x8xbf16>
    %74 = vector.extract_strided_slice %16 {offsets = [0, 24], sizes = [8, 8], strides = [1, 1]} : vector<8x32xbf16> to vector<8x8xbf16>
    "tpu.trace_start"() <{level = 10 : i32, message = "qd,kd->qk"}> : () -> ()
    %cst_23 = arith.constant dense<0.000000e+00> : vector<8x8xf32>
    %75 = tpu.matmul %73, %74, %cst_23 {dimension_numbers = #tpu.dot_dimension_numbers<[1], [1], [0], [0], [0, 0, 1, 0], [], []>} : vector<8x8xbf16>, vector<8x8xbf16>, vector<8x8xf32> -> vector<8x8xf32>
    "tpu.trace_stop"() : () -> ()
    %76 = arith.addf %75, %21 : vector<8x8xf32>
    %cst_24 = arith.constant dense<0xFF800000> : vector<8xf32>
    %77 = vector.multi_reduction <maximumf>, %76, %cst_24 [1] : vector<8x8xf32> to vector<8xf32>
    %78 = vector.shape_cast %77 : vector<8xf32> to vector<8x1xf32>
    %79 = vector.broadcast %78 : vector<8x1xf32> to vector<8x8xf32>
    %80 = arith.subf %76, %79 : vector<8x8xf32>
    %81 = math.exp %80 : vector<8x8xf32>
    %cst_25 = arith.constant dense<0.000000e+00> : vector<8xf32>
    %82 = vector.multi_reduction <add>, %81, %cst_25 [1] : vector<8x8xf32> to vector<8xf32>
    %83 = vector.shape_cast %82 : vector<8xf32> to vector<8x1xf32>
    %84 = tpu.reciprocal %83 {approx = true} : vector<8x1xf32> -> vector<8x1xf32>
    %85 = vector.broadcast %84 : vector<8x1xf32> to vector<8x8xf32>
    %86 = arith.mulf %81, %85 : vector<8x8xf32>
    %87 = arith.truncf %86 : vector<8x8xf32> to vector<8x8xbf16>
    %88 = vector.extract_strided_slice %17 {offsets = [0, 24], sizes = [8, 8], strides = [1, 1]} : vector<8x32xbf16> to vector<8x8xbf16>
    %cst_26 = arith.constant dense<0.000000e+00> : vector<8x8xf32>
    %89 = tpu.matmul %87, %88, %cst_26 {dimension_numbers = #tpu.dot_dimension_numbers<[1], [0], [0], [1], [0, 0, 1, 1], [], []>} : vector<8x8xbf16>, vector<8x8xbf16>, vector<8x8xf32> -> vector<8x8xf32>
    %90 = tpu.concatenate %38, %55, %72, %89 in 1 : vector<8x8xf32>, vector<8x8xf32>, vector<8x8xf32>, vector<8x8xf32> -> vector<8x32xf32>
    %91 = arith.truncf %90 : vector<8x32xf32> to vector<8x32xbf16>
    %c0_27 = arith.constant 0 : index
    %c0_28 = arith.constant 0 : index
    %92 = vector.load %arg5[%c0_27, %c0_28] : memref<32x32xbf16, #tpu.memory_space<vmem>>, vector<32x32xbf16>
    %cst_29 = arith.constant dense<0.000000e+00> : vector<8x32xf32>
    %93 = tpu.matmul %91, %92, %cst_29 {dimension_numbers = #tpu.dot_dimension_numbers<[1], [0], [0], [1], [0, 0, 1, 1], [], []>} : vector<8x32xbf16>, vector<32x32xbf16>, vector<8x32xf32> -> vector<8x32xf32>
    %c0_30 = arith.constant 0 : index
    %c0_31 = arith.constant 0 : index
    %94 = vector.load %arg6[%c0_30, %c0_31] : memref<1x32xf32, #tpu.memory_space<vmem>>, vector<1x32xf32>
    %95 = vector.broadcast %94 : vector<1x32xf32> to vector<8x32xf32>
    %96 = arith.addf %93, %95 : vector<8x32xf32>
    %97 = arith.addf %1, %96 : vector<8x32xf32>
    %cst_32 = arith.constant dense<0.000000e+00> : vector<8xf32>
    %98 = vector.multi_reduction <add>, %97, %cst_32 [1] : vector<8x32xf32> to vector<8xf32>
    %99 = vector.shape_cast %98 : vector<8xf32> to vector<8x1xf32>
    %cst_33 = arith.constant 3.200000e+01 : f32
    %100 = vector.broadcast %cst_33 : f32 to vector<8x1xf32>
    %101 = arith.divf %99, %100 : vector<8x1xf32>
    %102 = vector.broadcast %101 : vector<8x1xf32> to vector<8x32xf32>
    %103 = arith.subf %97, %102 : vector<8x32xf32>
    %104 = arith.mulf %103, %103 : vector<8x32xf32>
    %cst_34 = arith.constant dense<0.000000e+00> : vector<8xf32>
    %105 = vector.multi_reduction <add>, %104, %cst_34 [1] : vector<8x32xf32> to vector<8xf32>
    %106 = vector.shape_cast %105 : vector<8xf32> to vector<8x1xf32>
    %cst_35 = arith.constant 3.200000e+01 : f32
    %107 = vector.broadcast %cst_35 : f32 to vector<8x1xf32>
    %108 = arith.divf %106, %107 : vector<8x1xf32>
    %109 = vector.broadcast %101 : vector<8x1xf32> to vector<8x32xf32>
    %110 = arith.subf %97, %109 : vector<8x32xf32>
    %cst_36 = arith.constant 9.99999974E-6 : f32
    %111 = vector.broadcast %cst_36 : f32 to vector<8x1xf32>
    %112 = arith.addf %108, %111 : vector<8x1xf32>
    %113 = math.rsqrt %112 : vector<8x1xf32>
    %114 = vector.broadcast %113 : vector<8x1xf32> to vector<8x32xf32>
    %115 = arith.mulf %110, %114 : vector<8x32xf32>
    %c0_37 = arith.constant 0 : index
    %c0_38 = arith.constant 0 : index
    %116 = vector.load %arg7[%c0_37, %c0_38] : memref<1x32xf32, #tpu.memory_space<vmem>>, vector<1x32xf32>
    %117 = vector.broadcast %116 : vector<1x32xf32> to vector<8x32xf32>
    %118 = arith.mulf %115, %117 : vector<8x32xf32>
    %c0_39 = arith.constant 0 : index
    %c0_40 = arith.constant 0 : index
    %119 = vector.load %arg8[%c0_39, %c0_40] : memref<1x32xf32, #tpu.memory_space<vmem>>, vector<1x32xf32>
    %120 = vector.broadcast %119 : vector<1x32xf32> to vector<8x32xf32>
    %121 = arith.addf %118, %120 : vector<8x32xf32>
    %122 = arith.truncf %121 : vector<8x32xf32> to vector<8x32xbf16>
    %c0_41 = arith.constant 0 : index
    %c0_42 = arith.constant 0 : index
    %123 = vector.load %arg9[%c0_41, %c0_42] : memref<32x64xbf16, #tpu.memory_space<vmem>>, vector<32x64xbf16>
    %cst_43 = arith.constant dense<0.000000e+00> : vector<8x64xf32>
    %124 = tpu.matmul %122, %123, %cst_43 {dimension_numbers = #tpu.dot_dimension_numbers<[1], [0], [0], [1], [0, 0, 1, 1], [], []>} : vector<8x32xbf16>, vector<32x64xbf16>, vector<8x64xf32> -> vector<8x64xf32>
    %c0_44 = arith.constant 0 : index
    %c0_45 = arith.constant 0 : index
    %125 = vector.load %arg10[%c0_44, %c0_45] : memref<1x64xf32, #tpu.memory_space<vmem>>, vector<1x64xf32>
    %126 = vector.broadcast %125 : vector<1x64xf32> to vector<8x64xf32>
    %127 = arith.addf %124, %126 : vector<8x64xf32>
    %cst_46 = arith.constant 0.000000e+00 : f32
    %128 = vector.broadcast %cst_46 : f32 to vector<8x64xf32>
    %129 = arith.maximumf %127, %128 : vector<8x64xf32>
    %130 = arith.truncf %129 : vector<8x64xf32> to vector<8x64xbf16>
    %c0_47 = arith.constant 0 : index
    %c0_48 = arith.constant 0 : index
    %131 = vector.load %arg11[%c0_47, %c0_48] : memref<64x32xbf16, #tpu.memory_space<vmem>>, vector<64x32xbf16>
    %cst_49 = arith.constant dense<0.000000e+00> : vector<8x32xf32>
    %132 = tpu.matmul %130, %131, %cst_49 {dimension_numbers = #tpu.dot_dimension_numbers<[1], [0], [0], [1], [0, 0, 1, 1], [], []>} : vector<8x64xbf16>, vector<64x32xbf16>, vector<8x32xf32> -> vector<8x32xf32>
    %c0_50 = arith.constant 0 : index
    %c0_51 = arith.constant 0 : index
    %133 = vector.load %arg12[%c0_50, %c0_51] : memref<1x32xf32, #tpu.memory_space<vmem>>, vector<1x32xf32>
    %134 = vector.broadcast %133 : vector<1x32xf32> to vector<8x32xf32>
    %135 = arith.addf %132, %134 : vector<8x32xf32>
    %136 = arith.addf %121, %135 : vector<8x32xf32>
    %cst_52 = arith.constant dense<0.000000e+00> : vector<8xf32>
    %137 = vector.multi_reduction <add>, %136, %cst_52 [1] : vector<8x32xf32> to vector<8xf32>
    %138 = vector.shape_cast %137 : vector<8xf32> to vector<8x1xf32>
    %cst_53 = arith.constant 3.200000e+01 : f32
    %139 = vector.broadcast %cst_53 : f32 to vector<8x1xf32>
    %140 = arith.divf %138, %139 : vector<8x1xf32>
    %141 = vector.broadcast %140 : vector<8x1xf32> to vector<8x32xf32>
    %142 = arith.subf %136, %141 : vector<8x32xf32>
    %143 = arith.mulf %142, %142 : vector<8x32xf32>
    %cst_54 = arith.constant dense<0.000000e+00> : vector<8xf32>
    %144 = vector.multi_reduction <add>, %143, %cst_54 [1] : vector<8x32xf32> to vector<8xf32>
    %145 = vector.shape_cast %144 : vector<8xf32> to vector<8x1xf32>
    %cst_55 = arith.constant 3.200000e+01 : f32
    %146 = vector.broadcast %cst_55 : f32 to vector<8x1xf32>
    %147 = arith.divf %145, %146 : vector<8x1xf32>
    %148 = vector.broadcast %140 : vector<8x1xf32> to vector<8x32xf32>
    %149 = arith.subf %136, %148 : vector<8x32xf32>
    %cst_56 = arith.constant 9.99999974E-6 : f32
    %150 = vector.broadcast %cst_56 : f32 to vector<8x1xf32>
    %151 = arith.addf %147, %150 : vector<8x1xf32>
    %152 = math.rsqrt %151 : vector<8x1xf32>
    %153 = vector.broadcast %152 : vector<8x1xf32> to vector<8x32xf32>
    %154 = arith.mulf %149, %153 : vector<8x32xf32>
    %c0_57 = arith.constant 0 : index
    %c0_58 = arith.constant 0 : index
    %155 = vector.load %arg13[%c0_57, %c0_58] : memref<1x32xf32, #tpu.memory_space<vmem>>, vector<1x32xf32>
    %156 = vector.broadcast %155 : vector<1x32xf32> to vector<8x32xf32>
    %157 = arith.mulf %154, %156 : vector<8x32xf32>
    %c0_59 = arith.constant 0 : index
    %c0_60 = arith.constant 0 : index
    %158 = vector.load %arg14[%c0_59, %c0_60] : memref<1x32xf32, #tpu.memory_space<vmem>>, vector<1x32xf32>
    %159 = vector.broadcast %158 : vector<1x32xf32> to vector<8x32xf32>
    %160 = arith.addf %157, %159 : vector<8x32xf32>
    %c0_61 = arith.constant 0 : index
    %c0_62 = arith.constant 0 : index
    %c0_63 = arith.constant 0 : index
    %161 = vector.load %arg15[%c0_61, %c0_62, %c0_63] : memref<1x8x32xf32, #tpu.memory_space<vmem>>, vector<1x8x32xf32>
    %162 = vector.shape_cast %161 : vector<1x8x32xf32> to vector<8x32xf32>
    %163 = vector.shape_cast %160 : vector<8x32xf32> to vector<1x8x32xf32>
    tpu.vector_store %arg15[%c0_61, %c0_62, %c0_63], %163 {strides = array<i32>} : memref<1x8x32xf32, #tpu.memory_space<vmem>>, vector<1x8x32xf32>,
    return
  }
  func.func @transform_0(%arg0: i32) -> (i32, i32, i32) {
    %c0_i32 = arith.constant 0 : i32
    %c0_i32_0 = arith.constant 0 : i32
    %c0_i32_1 = arith.constant 0 : i32
    return %arg0, %c0_i32, %c0_i32_0 : i32, i32, i32
  }
  func.func @transform_1(%arg0: i32) -> (i32, i32, i32) {
    %c0_i32 = arith.constant 0 : i32
    %c0_i32_0 = arith.constant 0 : i32
    %c0_i32_1 = arith.constant 0 : i32
    return %arg0, %c0_i32, %c0_i32_0 : i32, i32, i32
  }
  func.func @transform_2(%arg0: i32) -> (i32, i32) {
    %c0_i32 = arith.constant 0 : i32
    %c0_i32_0 = arith.constant 0 : i32
    %c0_i32_1 = arith.constant 0 : i32
    return %c0_i32, %c0_i32_0 : i32, i32
  }
  func.func @transform_3(%arg0: i32) -> (i32, i32) {
    %c0_i32 = arith.constant 0 : i32
    %c0_i32_0 = arith.constant 0 : i32
    %c0_i32_1 = arith.constant 0 : i32
    return %c0_i32, %c0_i32_0 : i32, i32
  }
  func.func @transform_4(%arg0: i32) -> (i32, i32) {
    %c0_i32 = arith.constant 0 : i32
    %c0_i32_0 = arith.constant 0 : i32
    %c0_i32_1 = arith.constant 0 : i32
    return %c0_i32, %c0_i32_0 : i32, i32
  }
  func.func @transform_5(%arg0: i32) -> (i32, i32) {
    %c0_i32 = arith.constant 0 : i32
    %c0_i32_0 = arith.constant 0 : i32
    %c0_i32_1 = arith.constant 0 : i32
    return %c0_i32, %c0_i32_0 : i32, i32
  }
  func.func @transform_6(%arg0: i32) -> (i32, i32) {
    %c0_i32 = arith.constant 0 : i32
    %c0_i32_0 = arith.constant 0 : i32
    %c0_i32_1 = arith.constant 0 : i32
    return %c0_i32, %c0_i32_0 : i32, i32
  }
  func.func @transform_7(%arg0: i32) -> (i32, i32) {
    %c0_i32 = arith.constant 0 : i32
    %c0_i32_0 = arith.constant 0 : i32
    %c0_i32_1 = arith.constant 0 : i32
    return %c0_i32, %c0_i32_0 : i32, i32
  }
  func.func @transform_8(%arg0: i32) -> (i32, i32) {
    %c0_i32 = arith.constant 0 : i32
    %c0_i32_0 = arith.constant 0 : i32
    %c0_i32_1 = arith.constant 0 : i32
    return %c0_i32, %c0_i32_0 : i32, i32
  }
  func.func @transform_9(%arg0: i32) -> (i32, i32) {
    %c0_i32 = arith.constant 0 : i32
    %c0_i32_0 = arith.constant 0 : i32
    %c0_i32_1 = arith.constant 0 : i32
    return %c0_i32, %c0_i32_0 : i32, i32
  }
  func.func @transform_10(%arg0: i32) -> (i32, i32) {
    %c0_i32 = arith.constant 0 : i32
    %c0_i32_0 = arith.constant 0 : i32
    %c0_i32_1 = arith.constant 0 : i32
    return %c0_i32, %c0_i32_0 : i32, i32
  }
  func.func @transform_11(%arg0: i32) -> (i32, i32) {
    %c0_i32 = arith.constant 0 : i32
    %c0_i32_0 = arith.constant 0 : i32
    %c0_i32_1 = arith.constant 0 : i32
    return %c0_i32, %c0_i32_0 : i32, i32
  }
  func.func @transform_12(%arg0: i32) -> (i32, i32) {
    %c0_i32 = arith.constant 0 : i32
    %c0_i32_0 = arith.constant 0 : i32
    %c0_i32_1 = arith.constant 0 : i32
    return %c0_i32, %c0_i32_0 : i32, i32
  }
  func.func @transform_13(%arg0: i32) -> (i32, i32) {
    %c0_i32 = arith.constant 0 : i32
    %c0_i32_0 = arith.constant 0 : i32
    %c0_i32_1 = arith.constant 0 : i32
    return %c0_i32, %c0_i32_0 : i32, i32
  }
  func.func @transform_14(%arg0: i32) -> (i32, i32, i32) {
    %c0_i32 = arith.constant 0 : i32
    %c0_i32_0 = arith.constant 0 : i32
    %c0_i32_1 = arith.constant 0 : i32
    return %arg0, %c0_i32, %c0_i32_0 : i32, i32, i32
  }
}

</mosaic_0001>

<bundles_post_ra>
// kernel: tpu_custom_call.1
= control target key start
LH: loop header
LB: loop body
LE: loop exit
PB: predicated region body
PF: predicated region fallthrough
CT: control target
= control target key end

     0   :  { %s2132_s0 = inlined_call_operand.vmem [shape: f32[2,8,32], index: 0, kind: input, shape index: {}]   ;;  %s2133_s1 = inlined_call_operand.vmem [shape: f32[2,1,8], index: 1, kind: input, shape index: {}]   ;;  %s2134_s2 = inlined_call_operand.vmem [shape: bf16[32,96], index: 2, kind: input, shape index: {}]   ;;  %s2135_s3 = inlined_call_operand.vmem [shape: f32[1,96], index: 3, kind: input, shape index: {}]   ;;  %s2136_s4 = inlined_call_operand.vmem [shape: bf16[32,32], index: 4, kind: input, shape index: {}]   ;;  %s2137_s5 = inlined_call_operand.vmem [shape: f32[1,32], index: 5, kind: input, shape index: {}]   ;;  %s2138_s6 = inlined_call_operand.vmem [shape: f32[1,32], index: 6, kind: input, shape index: {}]   ;;  %s2139_s7 = inlined_call_operand.vmem [shape: f32[1,32], index: 7, kind: input, shape index: {}]   ;;  %s2140_s8 = inlined_call_operand.hbm [shape: bf16[32,64], index: 8, kind: input, shape index: {}]   ;;  %s2141_s9 = inlined_call_operand.vmem [shape: f32[1,64], index: 9, kind: input, shape index: {}]   ;;  %s2142_s10 = inlined_call_operand.vmem [shape: bf16[64,32], index: 10, kind: input, shape index: {}]   ;;  %s2143_s11 = inlined_call_operand.vmem [shape: f32[1,32], index: 11, kind: input, shape index: {}]   ;;  %s2144_s12 = inlined_call_operand.vmem [shape: f32[1,32], index: 12, kind: input, shape index: {}]   ;;  %s2145_s13 = inlined_call_operand.vmem [shape: f32[1,32], index: 13, kind: input, shape index: {}]   ;;  %s2146_s14 = inlined_call_operand.hbm [shape: f32[2,8,32], index: 14, kind: output, shape index: {}]  }
   0x1   :  { %2154 = sst [smem:[#allocation12_spill]] %s2132_s0 }
   0x2   :  { %19 = vsyncpa [#allocation3], 0 }
   0x3   :  { %20 = vsyncpa [#allocation4], 0 }
   0x4   :  { %22 = vsyncpa [#allocation4 + $0x1], 0  ;;  %s1852_s29 = smov 0   ;;  %s1854_s30 = smov 0  }
   0x5   :  { %s1856_s15 = smov 0   ;;  %s1858_s16 = smov 0  }
   0x6 LB: > { %2155 = sst [smem:[#allocation8_spill]] %s1751_s15  ;;  %s1873_s17 = sadd.s32 4294967295, %s1755_s16   ;;  %s1755_s16 = sphi %s1858_s16, %s2170_s16   ;;  %s1751_s15 = sphi %s1856_s15, %s2172_s15   ;;  %s1747_s30 = sphi %s1854_s30, %s2174_s30   ;;  %s1743_s29 = sphi %s1852_s29, %s2173_s29  }
   0x7   : > { %s1407_s18 = sadd.s32 4294967294, %s1755_s16   ;;  %s1877_s19 = sadd.s32 1, %s1755_s16  }
   0x8   : > { %2156 = sst [smem:[#allocation9_spill]] %s1877_s19  ;;  %s339_s20 = sadd.s32 1, %s1751_s15 }
   0x9   : > { %s336_s21 = ssub.s32 %s1755_s16, %s1877_s19  ;;  %p349_p0 = scmp.ne.s32.totalorder %s1751_s15, %s1747_s30 }
   0xa   : > { %p337_p1 = scmp.eq.s32.totalorder %s336_s21, 0  ;;  %p350_p2 = scmp.eq.s32.totalorder %s1873_s17, 1 }
   0xb   : > { %p355_p3 = scmp.ne.s32.totalorder %s1747_s30, %s1743_s29  ;;  %p356_p4 = scmp.eq.s32.totalorder %s1407_s18, 1 }
   0xc   : > { %s1888_s22 = scalar_select %p337_p1, %s1751_s15, %s339_s20  }
   0xd   : > { %p1890_p5 = por %p350_p2, %p349_p0  ;;  %p1894_p6 = por %p356_p4, %p355_p3 }
   0xe   : > { %2157 = sst [smem:[#allocation10_spill]] %s1888_s22  ;;  %p1408_p7 = scmp.ge.s32.totalorder %s1755_s16, 1 }
   0xf   : > { %s2158_s23 = scalar_select %p1890_p5, 1, 0 }
  0x10   : > { %s2159_s24 = scalar_select %p1894_p6, 1, 0 }
  0x11   : > { %p363_p8 = scmp.lt.s32.totalorder %s1755_s16, 3  ;;  %p2151_p9 = scmp.eq.s32.totalorder %s1873_s17, 0 }
  0x12   : > { %2160 = sst [smem:[#allocation11_spill]] %s2159_s24  ;;  %s1757_s26 = smov [#allocation2]  }
  0x13   : > { %p1901_p10 = pnand %p1408_p7, %p363_p8  ;;  %s393_s27 = sshll.u32 %s1757_s26, 4  ;;  %s394_s27 = int_to_ptr.vmem [resolvable:$true] %s393_s27 }
  0x14   : > { %s1661_s21 = scalar_lea.hbm %s2140_s8, 256 }
  0x15   : > { %s2161_s25 = scalar_select %p1901_p10, 1, 0 }
  0x16   : > { %p1569_p11 = pneg %p1901_p10  ;;  %p1662_p13 = scmp.ne.s32.totalorder %s2140_s8, %s1661_s21 }
  0x17   : > { %p1668_p3 = scmp.lt.u32.totalorder %s1661_s21, %s2140_s8 }
  0x18   : > { %p1909_p12 = pnand %p2151_p9, %p1569_p11 }
  0x1a   : > { %p1663_p0 = pneg %p1909_p12 }
  0x1c   : > { %p1664_p1 = pnand %p1663_p0, %p1662_p13 }
  0x1e   : > { %p1665_p2 = pneg %p1664_p1 }
  0x20   : > { %p1670_p4 = pnand %p1668_p3, %p1665_p2 }
  0x22   : > { %1673 = shalt.err (!%p1670_p4)
}
  0x23   : > { %s1674_s24 = scalar_lea.vmem %s394_s27, 256  ;;  %p1682_p9 = scmp.lt.s32.totalorder %s394_s27, %s394_s27 }
  0x24   : > { %p1675_p7 = scmp.ne.s32.totalorder %s394_s27, %s1674_s24  ;;  %p1683_p6 = scmp.lt.s32.totalorder %s1674_s24, %s1674_s24 }
  0x26   : > { %p1677_p8 = pnand %p1675_p7, %p1663_p0  ;;  %p1684_p5 = por %p1683_p6, %p1682_p9 }
  0x28   : > { %p1678_p11 = pneg %p1677_p8 }
  0x2a   : > { %p1685_p10 = pnand %p1684_p5, %p1678_p11 }
  0x2c   : > { %1688 = shalt.err (!%p1685_p10)
}
  0x2d   : > { %s1758_s15 = smov 64   ;;  %s1759_s22 = smov 4  }
  0x2e   : > { %1572 = dma.hbm_to_vmem [thread:$0]  (!%p1909_p12), %s2140_s8, 256, %s394_s27, [#allocation3], %s1758_s15, %s1758_s15, %s1759_s22  }
  0x2f   : > { %p2163_p13 = scmp.ne.s32.totalorder %s2161_s25, 0 }
  0x30   : > { %p2164_p1 = scmp.eq.s32.totalorder (!%p2163_p13), %s1873_s17, 0 }
  0x31   : > { %437 = sbr.rel (%p2163_p13) target bundleno = 2620 (0xa3c), region = 76 }
  0x38   : > { %1734 = dma.done.wait (%p2164_p1), [#allocation3], 256   ;;  %p2165_p0 = pmov %p2164_p1 }
  0x39   : > { %p485_p5 = scmp.lt.s32.totalorder %s1873_s17, 1  ;;  %v1760_v0 = vmov 0.0   ;;  %vm1761_vm0 = vmmov 0   ;;  %s2166_s0 = sld [smem:[#allocation12_spill]]  ;;  %v1631_v1 = vld [vmem:[%s2134_s2] sm:$0xff]   ;;  %v1632_v2 = vld [vmem:[%s2134_s2 + $0x8] sm:$0xff]   ;;  %v568_v25 = vlaneseq }
  0x3a   : > { %1736 = vsyncadd (%p2165_p0), [#allocation3], 4294967040  ;;  %1479 = vmatprep.subr.bf16.mxu0 %v1760_v0  ;;  %1483 = vmatprep.mubr.msk.bf16.mxu0 %vm1761_vm0, %v1760_v0  ;;  %vm519_vm1 = vcmask 261120   ;;  %v1415_v5 = vld [vmem:[%s2135_s3] ss:$0 sm:$0xff]  ;;  %s1763_s25 = smov 120  }
  0x3b   : > { %s1940_s19 = scalar_select %p485_p5, %s1873_s17, 1  ;;  %1487 = vmatprep.subr.bf16.mxu1 %v1760_v0  ;;  %1489 = vmatprep.mubr.msk.bf16.mxu1 %vm1761_vm0, %v1760_v0  ;;  %vm576_vm2 = vcmask 64512   ;;  %v569_v26 = vshrl.u32 %v568_v25, 7  ;;  %vm640_vm3 = vcmask 1043456   ;;  %vm1028_vm4 = vcmask 130048  }
  0x3c   : > { %1480 = vmatpush3.bf16.msra.mxu0 %v1631_v1  ;;  %s1764_s27 = smov 88   ;;  %s1766_s21 = smov 112   ;;  %vm1030_vm5 = vcmask 195584   ;;  %vm1238_vm6 = vcmask 523264  }
  0x3d   : > { %s1414_s24 = sshll.u32 %s1940_s19, 3  ;;  %1481 = vmatprep.subr.bf16.mxu0 %v1760_v0  ;;  %s1767_s26 = smov 72   ;;  %v570_v29 = vsub.s32 0, %v569_v26 }
  0x3e   : > { %s1768_s15 = smov 104   ;;  %s491_s20 = scalar_lea.vmem %s2133_s1, %s1940_s19 }
  0x3f   : > { %s488_s28 = scalar_lea.vmem %s2166_s0, %s1414_s24  ;;  %s1762_s24 = smov 96   ;;  %v494_v27 = vld [vmem:[%s491_s20] sm:$0x1] }
  0x40   : > { %v1955_v3 = vld [vmem:[%s488_s28] sm:$0xff]  ;;  %1482 = vmatpush3.bf16.msra.mxu0 %v1632_v2  ;;  %s1765_s28 = smov 80   ;;  %v566_v28 = vmul.f32 -1e+09, %v494_v27  ;;  %s1769_s19 = smov 56  }
  0x41   : > { %v495_v4 = vpack.c.bf16 %v1955_v3, %v1955_v3  ;;  %1493 = vmatprep.subr.bf16.mxu0 %v1760_v0  ;;  %s1774_s18 = smov 16   ;;  %s1775_s20 = smov 24  }
  0x42   : > { %v571_v30 = vrot.slane %v566_v28, %v570_v29  ;;  %p2167_p9 = scmp.ne.s32.totalorder %s2158_s23, 0 }
  0x43   : > { %1484 = vmatmul.mubr.msk.bf16.vlgmr.msra.gmra.mrb[0].mxu0 %vm519_vm1, %v495_v4 }
  0x44   : > { %1495 = vmatprep.mubr.msk.bf16.mxu0 %vm1761_vm0, %v1760_v0 }
 0x116   : > { %v557_v6 = vpop.f32.mrb[0].mxu0 }
 0x117   : > { %v558_v7 = vadd.f32 %v1415_v5, %v557_v6  ;;  %v1485_v8 = vpop.f32.mrb[1].mxu0 }
 0x118   : > { %v560_v9 = vpop.f32.mrb[2].mxu0 }
 0x119   : > { %v563_v10 = vmul.f32 0.35355338, %v558_v7  ;;  %v1967_v11 = vpack.c.bf16 %v558_v7, %v558_v7  ;;  %v1486_v12 = vpop.f32.mrb[3].mxu0 }
 0x11b   : > { %v564_v13 = vpack.c.bf16 %v563_v10, %v563_v10  ;;  %574 = vrot.lane.b32.xlu0 %v1967_v11, %s1762_s24  ;;  %s1770_s24 = smov 64  }
 0x11d   : > { %685 = vrot.lane.b32.xlu1 %v564_v13, %s1763_s25  ;;  %s1771_s25 = smov 40  }
 0x11f   : > { %687 = vrot.lane.b32.xlu0 %v1967_v11, %s1764_s27  ;;  %s1772_s27 = smov 48  }
 0x121   : > { %797 = vrot.lane.b32.xlu1 %v1967_v11, %s1765_s28  ;;  %s1773_s28 = smov 8  }
 0x123   : > { %795 = vrot.lane.b32.xlu0 %v564_v13, %s1766_s21 }
 0x125   : > { %907 = vrot.lane.b32.xlu1 %v1967_v11, %s1767_s26 }
 0x127   : > { %905 = vrot.lane.b32.xlu0 %v564_v13, %s1768_s15  ;;  %s482_s15 = sand.u32 1, %s1747_s30  }
 0x128   : > { %s1413_s22 = sshll.u32 %s482_s15, 3 }
 0x18d   : > { %v575_v14 = vpop.permute.xlu0 %574 }
 0x18e   : > { %v581_v15 = vsel %vm576_vm2, %v575_v14, 0 }
 0x18f   : > { %1488 = vmatpush3.bf16.xpose.msra.mxu1 %v581_v15  ;;  %v686_v17 = vpop.permute.xlu1 %685 }
 0x190   : > { %1499 = vmatprep.subr.bf16.mxu1 %v1760_v0 }
 0x191   : > { %v688_v16 = vpop.permute.xlu0 %687 }
 0x192   : > { %v693_v18 = vsel %vm576_vm2, %v688_v16, 0 }
 0x193   : > { %v798_v19 = vpop.permute.xlu1 %797 }
 0x194   : > { %v803_v20 = vsel %vm576_vm2, %v798_v19, 0 }
 0x195   : > { %v796_v22 = vpop.permute.xlu0 %795 }
 0x196   : > { %1490 = vmatmul.mubr.msk.bf16.vlgmr.msra.gmra.mrb[0].mxu1 %vm576_vm2, %v564_v13 }
 0x197   : > { %1500 = vmatpush3.bf16.xpose.msra.mxu1 %v693_v18  ;;  %1501 = vmatprep.mubr.msk.bf16.mxu1 %vm1761_vm0, %v1760_v0  ;;  %v908_v21 = vpop.permute.xlu1 %907 }
 0x198   : > { %1511 = vmatprep.subr.bf16.mxu1 %v1760_v0  ;;  %v913_v23 = vsel %vm576_vm2, %v908_v21, 0 }
 0x199   : > { %v906_v24 = vpop.permute.xlu0 %905 }
 0x19e   : > { %1502 = vmatmul.mubr.msk.bf16.vlgmr.msra.gmra.mrb[4].mxu1 %vm576_vm2, %v686_v17 }
 0x19f   : > { %1512 = vmatpush3.bf16.xpose.msra.mxu1 %v803_v20  ;;  %1513 = vmatprep.mubr.msk.bf16.mxu1 %vm1761_vm0, %v1760_v0 }
 0x1a0   : > { %1523 = vmatprep.subr.bf16.mxu1 %v1760_v0 }
 0x1a6   : > { %1514 = vmatmul.mubr.msk.bf16.vlgmr.msra.gmra.mrb[8].mxu1 %vm576_vm2, %v796_v22 }
 0x1a7   : > { %1524 = vmatpush3.bf16.xpose.msra.mxu1 %v913_v23  ;;  %1525 = vmatprep.mubr.msk.bf16.mxu1 %vm1761_vm0, %v1760_v0 }
 0x1a8   : > { %1535 = vmatprep.subr.bf16.mxu1 %v1760_v0 }
 0x1ae   : > { %1526 = vmatmul.mubr.msk.bf16.vlgmr.msra.gmra.mrb[12].mxu1 %vm576_vm2, %v906_v24 }
 0x1af   : > { %1539 = vmatprep.mubr.msk.bf16.mxu1 %vm1761_vm0, %v1760_v0 }
 0x269   : > { %v617_v31 = vpop.f32.mrb[0].mxu1 }
 0x26a   : > { %v618_v32 = vadd.f32 %v617_v31, %v571_v30  ;;  %v1491_v33 = vpop.f32.mrb[1].mxu1 }
 0x26b   : > { %v620_v34 = vpop.f32.mrb[2].mxu1 }
 0x26c   : > { %v1492_v35 = vpop.f32.mrb[3].mxu1  ;;  %v623_v36 = vsel %vm576_vm2, %v618_v32, -inf }
 0x26d   : > { %624 = vmax.xlane.f32.xlu1 %v623_v36 }
 0x271   : > { %v729_v37 = vpop.f32.mrb[4].mxu1 }
 0x272   : > { %v730_v38 = vadd.f32 %v729_v37, %v571_v30  ;;  %v1503_v39 = vpop.f32.mrb[5].mxu1 }
 0x273   : > { %v732_v40 = vpop.f32.mrb[6].mxu1 }
 0x274   : > { %v1504_v41 = vpop.f32.mrb[7].mxu1  ;;  %v735_v42 = vsel %vm576_vm2, %v730_v38, -inf }
 0x275   : > { %736 = vmax.xlane.f32.xlu0 %v735_v42 }
 0x279   : > { %v839_v43 = vpop.f32.mrb[8].mxu1 }
 0x27a   : > { %v840_v44 = vadd.f32 %v839_v43, %v571_v30  ;;  %v1515_v45 = vpop.f32.mrb[9].mxu1 }
 0x27b   : > { %v842_v46 = vpop.f32.mrb[10].mxu1  ;;  %v1633_v45 = vld [vmem:[%s2136_s4] sm:$0xff]  }
 0x27c   : > { %v1516_v47 = vpop.f32.mrb[11].mxu1  ;;  %v845_v48 = vsel %vm576_vm2, %v840_v44, -inf  ;;  %1536 = vmatpush3.bf16.msra.mxu1 %v1633_v45  ;;  %v1634_v46 = vld [vmem:[%s2136_s4 + $0x8] sm:$0xff]  }
 0x27d   : > { %846 = vmax.xlane.f32.xlu0 %v845_v48  ;;  %1537 = vmatprep.subr.bf16.mxu1 %v1760_v0 }
 0x280   : > { %1538 = vmatpush3.bf16.msra.mxu1 %v1634_v46 }
 0x281   : > { %v949_v49 = vpop.f32.mrb[12].mxu1  ;;  %1551 = vmatprep.subr.bf16.mxu1 %v1760_v0 }
 0x282   : > { %v950_v50 = vadd.f32 %v949_v49, %v571_v30  ;;  %v1527_v51 = vpop.f32.mrb[13].mxu1 }
 0x283   : > { %v952_v52 = vpop.f32.mrb[14].mxu1 }
 0x284   : > { %v1528_v53 = vpop.f32.mrb[15].mxu1  ;;  %v955_v54 = vsel %vm576_vm2, %v950_v50, -inf }
 0x285   : > { %956 = vmax.xlane.f32.xlu1 %v955_v54 }
 0x2fa   : > { %v625_v55 = vpop.xlane.xlu1 %624 }
 0x2fb   : > { %v626_v56 = vsub.f32 %v618_v32, %v625_v55 }
 0x2fd   : > { %v627_v57 = vmul.f32 1.442695, %v626_v56 }
 0x2ff   : > { %1641 = vpow2.f32 %v627_v57 }
 0x302   : > { %v737_v58 = vpop.xlane.xlu0 %736 }
 0x303   : > { %v738_v59 = vsub.f32 %v730_v38, %v737_v58 }
 0x305   : > { %v739_v60 = vmul.f32 1.442695, %v738_v59 }
 0x307   : > { %1643 = vpow2.f32 %v739_v60 }
 0x309   : > { %v1642_v61 = vpop.eup %1641 }
 0x30a   : > { %v847_v62 = vpop.xlane.xlu0 %846  ;;  %v629_v63 = vsel %vm576_vm2, %v1642_v61, 0.0 }
 0x30b   : > { %v848_v1 = vsub.f32 %v840_v44, %v847_v62  ;;  %630 = vadd.xlane.f32.xlu0 %v629_v63  ;;  %v1427_v62 = vld [vmem:[%s2137_s5] ss:$0 sm:$0xff] }
 0x30d   : > { %v849_v2 = vmul.f32 1.442695, %v848_v1 }
 0x30f   : > { %1645 = vpow2.f32 %v849_v2 }
 0x311   : > { %v1644_v4 = vpop.eup %1643 }
 0x312   : > { %v741_v5 = vsel %vm576_vm2, %v1644_v4, 0.0  ;;  %v957_v8 = vpop.xlane.xlu1 %956 }
 0x313   : > { %742 = vadd.xlane.f32.xlu1 %v741_v5  ;;  %v958_v9 = vsub.f32 %v950_v50, %v957_v8 }
 0x315   : > { %v959_v10 = vmul.f32 1.442695, %v958_v9 }
 0x317   : > { %1647 = vpow2.f32 %v959_v10 }
 0x319   : > { %v1646_v6 = vpop.eup %1645 }
 0x31a   : > { %v851_v7 = vsel %vm576_vm2, %v1646_v6, 0.0 }
 0x31b   : > { %852 = vadd.xlane.f32.xlu0 %v851_v7 }
 0x321   : > { %v1648_v12 = vpop.eup %1647 }
 0x322   : > { %v961_v13 = vsel %vm576_vm2, %v1648_v12, 0.0 }
 0x324   : > { %747 = vrot.lane.b32.xlu1 %v1967_v11, %s1769_s19 }
 0x331   : > { %635 = vrot.lane.b32.xlu0 %v1967_v11, %s1770_s24 }
 0x335   : > { %967 = vrot.lane.b32.xlu0 %v1967_v11, %s1771_s25  ;;  %s1446_s25 = sshll.u32 %s1873_s17, 7  ;;  %s1776_s17 = smov [#allocation5]  }
 0x336   : > { %s2089_s0 = scalar_lea.hbm %s2146_s14, %s1446_s25 }
 0x348   : > { %962 = vadd.xlane.f32.xlu1 %v961_v13 }
 0x359   : > { %857 = vrot.lane.b32.xlu1 %v1967_v11, %s1772_s27  ;;  %s484_s27 = scalar_lea.vmem [#allocation5], %s1413_s22  ;;  %s1693_s22 = sshll.u32 %s1776_s17, 4  ;;  %s1694_s22 = int_to_ptr.vmem [resolvable:$false] %s1693_s22 }
 0x35a   : > { %s1695_s19 = scalar_lea.vmem %s1694_s22, 256 }
 0x398   : > { %v631_v14 = vpop.xlane.xlu0 %630 }
 0x399   : > { %1649 = vrcp.f32 %v631_v14  ;;  %v1635_v14 = vld [vmem:[#allocation2] sm:$0xff]  }
 0x3a0   : > { %v743_v15 = vpop.xlane.xlu1 %742 }
 0x3a1   : > { %1651 = vrcp.f32 %v743_v15  ;;  %v1636_v15 = vld [vmem:[#allocation2 + $0x8] sm:$0xff]  }
 0x3a3   : > { %v1650_v16 = vpop.eup %1649 }
 0x3a4   : > { %v633_v18 = vmul.f32 %v1650_v16, %v1642_v61  ;;  %v748_v21 = vpop.permute.xlu1 %747  ;;  %v1638_v16 = vld [vmem:[%s2142_s10 + $0x8] sm:$0xff]  }
 0x3a5   : > { %v753_v24 = vsel %vm640_vm3, %v748_v21, 0  ;;  %v1431_v21 = vld [vmem:[%s2138_s6] ss:$0 sm:$0xff] }
 0x3a6   : > { %v634_v22 = vpack.c.bf16 %v633_v18, %v633_v18 }
 0x3a8   : > { %v853_v17 = vpop.xlane.xlu0 %852 }
 0x3a9   : > { %1653 = vrcp.f32 %v853_v17 }
 0x3ab   : > { %v1652_v23 = vpop.eup %1651 }
 0x3ac   : > { %v636_v19 = vpop.permute.xlu0 %635  ;;  %v745_v11 = vmul.f32 %v1652_v23, %v1644_v4  ;;  %v1432_v23 = vld [vmem:[%s2139_s7] ss:$0 sm:$0xff] }
 0x3ad   : > { %v642_v20 = vsel %vm640_vm3, %v636_v19, 0 }
 0x3ae   : > { %1494 = vmatpush3.bf16.msra.mxu0 %v642_v20  ;;  %v746_v25 = vpack.c.bf16 %v745_v11, %v745_v11 }
 0x3af   : > { %1505 = vmatprep.subr.bf16.mxu0 %v1760_v0 }
 0x3b0   : > { %v968_v31 = vpop.permute.xlu0 %967 }
 0x3b1   : > { %1496 = vmatmul.mubr.msk.bf16.vlgmr.msra.gmra.mrb[4].mxu0 %vm576_vm2, %v634_v22  ;;  %v973_v33 = vsel %vm640_vm3, %v968_v31, 0 }
 0x3b2   : > { %1506 = vmatpush3.bf16.msra.mxu0 %v753_v24  ;;  %1507 = vmatprep.mubr.msk.bf16.mxu0 %vm1761_vm0, %v1760_v0 }
 0x3b3   : > { %1517 = vmatprep.subr.bf16.mxu0 %v1760_v0  ;;  %v1654_v26 = vpop.eup %1653 }
 0x3b4   : > { %v855_v28 = vmul.f32 %v1654_v26, %v1646_v6  ;;  %v1639_v26 = vld [vmem:[%s2142_s10 + $0x10] sm:$0xff]  }
 0x3b6   : > { %v856_v32 = vpack.c.bf16 %v855_v28, %v855_v28  ;;  %v1433_v28 = vld [vmem:[%s2141_s9] ss:$0 sm:$0xff] }
 0x3b9   : > { %1508 = vmatmul.mubr.msk.bf16.vlgmr.msra.gmra.mrb[8].mxu0 %vm576_vm2, %v746_v25 }
 0x3ba   : > { %1519 = vmatprep.mubr.msk.bf16.mxu0 %vm1761_vm0, %v1760_v0 }
 0x3d5   : > { %v963_v27 = vpop.xlane.xlu1 %962 }
 0x3d6   : > { %1655 = vrcp.f32 %v963_v27  ;;  %v1640_v27 = vld [vmem:[%s2142_s10 + $0x18] sm:$0xff]  }
 0x3d9   : > { %v858_v29 = vpop.permute.xlu1 %857 }
 0x3da   : > { %v863_v30 = vsel %vm640_vm3, %v858_v29, 0 }
 0x3db   : > { %1518 = vmatpush3.bf16.msra.mxu0 %v863_v30 }
 0x3dc   : > { %1529 = vmatprep.subr.bf16.mxu0 %v1760_v0 }
 0x3de   : > { %1520 = vmatmul.mubr.msk.bf16.vlgmr.msra.gmra.mrb[12].mxu0 %vm576_vm2, %v856_v32 }
 0x3df   : > { %1530 = vmatpush3.bf16.msra.mxu0 %v973_v33  ;;  %1531 = vmatprep.mubr.msk.bf16.mxu0 %vm1761_vm0, %v1760_v0 }
 0x3e0   : > { %v1656_v34 = vpop.eup %1655  ;;  %1543 = vmatprep.subr.bf16.mxu0 %v1760_v0 }
 0x3e1   : > { %v965_v35 = vmul.f32 %v1656_v34, %v1648_v12 }
 0x3e3   : > { %v966_v36 = vpack.c.bf16 %v965_v35, %v965_v35 }
 0x3e6   : > { %1532 = vmatmul.mubr.msk.bf16.vlgmr.msra.gmra.mrb[16].mxu0 %vm576_vm2, %v966_v36 }
 0x3e7   : > { %1547 = vmatprep.mubr.msk.bf16.mxu0 %vm1761_vm0, %v1760_v0  ;;  %1544 = vmatpush3.bf16.msra.mxu0 %v1635_v14 }
 0x3e8   : > { %1545 = vmatprep.subr.bf16.mxu0 %v1760_v0 }
 0x3eb   : > { %1546 = vmatpush3.bf16.msra.mxu0 %v1636_v15 }
 0x484   : > { %v678_v37 = vpop.f32.mrb[4].mxu0 }
 0x485   : > { %v1497_v38 = vpop.f32.mrb[5].mxu0 }
 0x486   : > { %v681_v39 = vpop.f32.mrb[6].mxu0 }
 0x487   : > { %v1498_v40 = vpop.f32.mrb[7].mxu0 }
 0x48c   : > { %v789_v41 = vpop.f32.mrb[8].mxu0 }
 0x48d   : > { %1016 = vrot.lane.b32.xlu1 %v789_v41, %s1773_s28  ;;  %v1509_v42 = vpop.f32.mrb[9].mxu0  ;;  %s1327_s28 = sshll.u32 %s484_s27, 4  ;;  %s2091_s28 = int_to_ptr.vmem [resolvable:$true] %s1327_s28 }
 0x48e   : > { %v792_v43 = vpop.f32.mrb[10].mxu0  ;;  %p1696_p2 = scmp.lt.s32.totalorder %s2091_s28, %s1694_s22 }
 0x48f   : > { %v1510_v44 = vpop.f32.mrb[11].mxu0 }
 0x4b1   : > { %v899_v47 = vpop.f32.mrb[12].mxu0 }
 0x4b2   : > { %1020 = vrot.lane.b32.xlu0 %v899_v47, %s1774_s18  ;;  %v1521_v48 = vpop.f32.mrb[13].mxu0  ;;  %s1314_s18 = scalar_lea.sflag [#allocation4], %s482_s15 }
 0x4b3   : > { %v902_v49 = vpop.f32.mrb[14].mxu0 }
 0x4b4   : > { %v1522_v50 = vpop.f32.mrb[15].mxu0 }
 0x4b9   : > { %v1009_v51 = vpop.f32.mrb[16].mxu0 }
 0x4ba   : > { %1024 = vrot.lane.b32.xlu1 %v1009_v51, %s1775_s20  ;;  %v1533_v52 = vpop.f32.mrb[17].mxu0  ;;  %s1689_s20 = scalar_lea.vmem %s2091_s28, 128 }
 0x4bb   : > { %v1012_v53 = vpop.f32.mrb[18].mxu0  ;;  %v1443_v52 = vld [vmem:[%s2144_s12] ss:$0 sm:$0xff]  ;;  %p1690_p6 = scmp.ne.s32.totalorder %s2091_s28, %s1689_s20  ;;  %p1697_p3 = scmp.lt.s32.totalorder %s1695_s19, %s1689_s20 }
 0x4bc   : > { %v1534_v54 = vpop.f32.mrb[19].mxu0 }
 0x4bd   : > { %v1444_v54 = vld [vmem:[%s2145_s13] ss:$0 sm:$0xff]  ;;  %p1691_p10 = pnand %p1690_p6, %p2167_p9  ;;  %p1698_p4 = por %p1697_p3, %p1696_p2 }
 0x4bf   : > { %p1692_p12 = pneg %p1691_p10 }
 0x4c1   : > { %p1699_p7 = pnand %p1698_p4, %p1692_p12 }
 0x4ff   : > { %v1017_v55 = vpop.permute.xlu1 %1016 }
 0x500   : > { %v1027_v57 = vsel %vm576_vm2, %v678_v37, %v1017_v55 }
 0x524   : > { %v1021_v56 = vpop.permute.xlu0 %1020 }
 0x525   : > { %v1029_v58 = vsel %vm1028_vm4, %v1027_v57, %v1021_v56 }
 0x52c   : > { %v1025_v59 = vpop.permute.xlu1 %1024 }
 0x52d   : > { %v1031_v60 = vsel %vm1030_vm5, %v1029_v58, %v1025_v59 }
 0x52e   : > { %v1032_v61 = vpack.c.bf16 %v1031_v60, %v1031_v60 }
 0x530   : > { %1540 = vmatmul.mubr.msk.bf16.vlgmr.msra.gmra.mrb[16].mxu1 %vm519_vm1, %v1032_v61 }
 0x531   : > { %1559 = vmatprep.mubr.msk.bf16.mxu1 %vm1761_vm0, %v1760_v0 }
 0x603   : > { %v1093_v63 = vpop.f32.mrb[16].mxu1 }
 0x604   : > { %v1094_v1 = vadd.f32 %v1427_v62, %v1093_v63  ;;  %v1541_v2 = vpop.f32.mrb[17].mxu1 }
 0x605   : > { %v1096_v4 = vpop.f32.mrb[18].mxu1 }
 0x606   : > { %v1542_v5 = vpop.f32.mrb[19].mxu1  ;;  %v1099_v6 = vadd.f32 %v1094_v1, %v1955_v3  ;;  %v1637_v3 = vld [vmem:[%s2142_s10] sm:$0xff]  }
 0x607   : > { %1552 = vmatpush3.bf16.msra.mxu1 %v1637_v3 }
 0x608   : > { %v1100_v7 = vsel %vm519_vm1, %v1099_v6, 0.0  ;;  %1553 = vmatprep.subr.bf16.mxu1 %v1760_v0 }
 0x609   : > { %1101 = vadd.xlane.f32.xlu0 %v1100_v7 }
 0x60b   : > { %1554 = vmatpush3.bf16.msra.mxu1 %v1638_v16 }
 0x60c   : > { %1555 = vmatprep.subr.bf16.mxu1 %v1760_v0 }
 0x60f   : > { %1556 = vmatpush3.bf16.msra.mxu1 %v1639_v26 }
 0x610   : > { %1557 = vmatprep.subr.bf16.mxu1 %v1760_v0  ;;  %v1437_v0 = vld [vmem:[%s2143_s11] ss:$0 sm:$0xff] }
 0x613   : > { %1558 = vmatpush3.bf16.msra.mxu1 %v1640_v27 }
 0x696   : > { %v1102_v8 = vpop.xlane.xlu0 %1101 }
 0x697   : > { %v1104_v9 = vmul.f32 0.03125, %v1102_v8 }
 0x699   : > { %v1105_v10 = vsub.f32 %v1099_v6, %v1104_v9 }
 0x69b   : > { %v1106_v12 = vmul.f32 %v1105_v10, %v1105_v10 }
 0x69d   : > { %v1107_v13 = vsel %vm519_vm1, %v1106_v12, 0.0 }
 0x69e   : > { %1108 = vadd.xlane.f32.xlu1 %v1107_v13 }
 0x72b   : > { %v1109_v17 = vpop.xlane.xlu1 %1108 }
 0x72c   : > { %v1110_v18 = vmul.f32 0.03125, %v1109_v17 }
 0x72e   : > { %v1111_v19 = vadd.f32 1e-05, %v1110_v18 }
 0x730   : > { %1657 = vrsqrt.f32 %v1111_v19 }
 0x73a   : > { %v1658_v20 = vpop.eup %1657 }
 0x73b   : > { %v1113_v22 = vmul.f32 %v1658_v20, %v1105_v10 }
 0x73d   : > { %v1121_v24 = vmul.f32 %v1431_v21, %v1113_v22 }
 0x73f   : > { %v1129_v11 = vadd.f32 %v1432_v23, %v1121_v24 }
 0x741   : > { %v1130_v25 = vpack.c.bf16 %v1129_v11, %v1129_v11 }
 0x743   : > { %1548 = vmatmul.mubr.msk.bf16.vlgmr.msra.gmra.mrb[20].mxu0 %vm519_vm1, %v1130_v25 }
 0x816   : > { %v1191_v29 = vpop.f32.mrb[20].mxu0 }
 0x817   : > { %v1192_v30 = vadd.f32 %v1433_v28, %v1191_v29  ;;  %v1549_v31 = vpop.f32.mrb[21].mxu0 }
 0x818   : > { %v1194_v32 = vpop.f32.mrb[22].mxu0 }
 0x819   : > { %v1197_v33 = vmax.f32 %v1192_v30, 0.0  ;;  %v1550_v34 = vpop.f32.mrb[23].mxu0 }
 0x81b   : > { %v1198_v35 = vpack.c.bf16 %v1197_v33, %v1197_v33 }
 0x81d   : > { %1560 = vmatmul.mubr.msk.bf16.vlgmr.msra.gmra.mrb[20].mxu1 %vm1238_vm6, %v1198_v35 }
 0x8f0   : > { %v1276_v36 = vpop.f32.mrb[20].mxu1 }
 0x8f1   : > { %v1277_v37 = vadd.f32 %v1437_v0, %v1276_v36  ;;  %v1561_v38 = vpop.f32.mrb[21].mxu1 }
 0x8f2   : > { %v1279_v39 = vpop.f32.mrb[22].mxu1 }
 0x8f3   : > { %v1562_v40 = vpop.f32.mrb[23].mxu1  ;;  %v1282_v41 = vadd.f32 %v1277_v37, %v1129_v11 }
 0x8f5   : > { %v1283_v42 = vsel %vm519_vm1, %v1282_v41, 0.0 }
 0x8f6   : > { %1284 = vadd.xlane.f32.xlu0 %v1283_v42 }
 0x983   : > { %v1285_v43 = vpop.xlane.xlu0 %1284 }
 0x984   : > { %v1286_v44 = vmul.f32 0.03125, %v1285_v43 }
 0x986   : > { %v1287_v45 = vsub.f32 %v1282_v41, %v1286_v44 }
 0x988   : > { %v1288_v46 = vmul.f32 %v1287_v45, %v1287_v45 }
 0x98a   : > { %v1289_v47 = vsel %vm519_vm1, %v1288_v46, 0.0 }
 0x98b   : > { %1290 = vadd.xlane.f32.xlu0 %v1289_v47 }
 0xa18   : > { %v1291_v48 = vpop.xlane.xlu0 %1290 }
 0xa19   : > { %v1292_v49 = vmul.f32 0.03125, %v1291_v48 }
 0xa1b   : > { %v1293_v50 = vadd.f32 1e-05, %v1292_v49 }
 0xa1d   : > { %1659 = vrsqrt.f32 %v1293_v50 }
 0xa27   : > { %v1660_v51 = vpop.eup %1659 }
 0xa28   : > { %v1295_v53 = vmul.f32 %v1660_v51, %v1287_v45 }
 0xa2a   : > { %v1303_v55 = vmul.f32 %v1443_v52, %v1295_v53 }
 0xa2c   : > { %v1311_v56 = vadd.f32 %v1444_v54, %v1303_v55 }
 0xa2e   : > { %1312 = vst.msk [vmem:[%s484_s27] sm:$0xff] %vm519_vm1, %v1311_v56 }
 0xa2f   : > { %1702 = shalt.err (!%p1699_p7)
}
 0xa30   : > { %s1703_s15 = scalar_lea.hbm %s2089_s0, 128  ;;  %s1707_s27 = scalar_lea.hbm %s2146_s14, 256 }
 0xa31   : > { %p1704_p8 = scmp.ne.s32.totalorder %s2089_s0, %s1703_s15  ;;  %p1708_p1 = scmp.lt.u32.totalorder %s2089_s0, %s2146_s14 }
 0xa32   : > { %p1709_p0 = scmp.lt.u32.totalorder %s1707_s27, %s1703_s15  ;;  %p1711_p6 = scmp.lt.u32.totalorder %s1703_s15, %s2089_s0 }
 0xa33   : > { %p1705_p11 = pnand %p1704_p8, %p2167_p9 }
 0xa34   : > { %p1710_p5 = por %p1709_p0, %p1708_p1 }
 0xa35   : > { %p1706_p13 = pneg %p1705_p11 }
 0xa36   : > { %p1712_p10 = por %p1711_p6, %p1710_p5 }
 0xa38   : > { %p1713_p12 = pnand %p1712_p10, %p1706_p13 }
 0xa3a   : > { %1716 = shalt.err (!%p1713_p12)
}
 0xa3b   : > { %1567 = dma.vmem_to_hbm [thread:$0]  (%p2167_p9), %s2091_s28, 128, %s2089_s0, %s1314_s18  }
 0xa3c PF: > { %s2168_s20 = sld [smem:[#allocation11_spill]]  ;;  %p1579_p2 = scmp.ge.s32.totalorder %s1755_s16, 2 }
 0xa3d   : > { %s1339_s17 = sand.u32 1, %s1743_s29  }
 0xa3e   : > { %s1340_s22 = scalar_lea.sflag [#allocation4], %s1339_s17 }
 0xa42   : > { %p2169_p3 = scmp.ne.s32.totalorder %s2168_s20, 0 }
 0xa44   : > { %p1574_p4 = pnand %p1579_p2, %p2169_p3 }
 0xa46   : > { %1738 = dma.done.wait (!%p1574_p4), %s1340_s22, 128  }
 0xa47   : > { %1740 = vsyncadd (!%p1574_p4), %s1340_s22, 4294967168  ;;  %s2170_s16 = sld [smem:[#allocation9_spill]]  ;;  %s2171_s19 = sld [smem:[#allocation8_spill]] }
 0xa48   : > { %s2172_s15 = sld [smem:[#allocation10_spill]]  ;;  %s2173_s29 = smov %s1747_s30 }
 0xa4d   : > { %p25_p7 = scmp.ge.s32.totalorder %s2170_s16, 4   ;;  %s2174_s30 = smov %s2171_s19 }
 0xa4f   :  { %27 = sbr.rel (!%p25_p7) target bundleno = 6 (0x6), region = 119 }
 0xa56   :  { %1345 = vsyncpa [#allocation3], 1 }
 0xa57   :  { %1347 = vsyncpa [#allocation3 + $0x1], 1 }
 0xa58   :  { %1348 = vsyncpa [#allocation4], 1 }
 0xa59   :  { %1350 = vsyncpa [#allocation4 + $0x1], 1 }

</bundles_post_ra>
